<compile_context>
chip_gen: v6e
topology: v6e:2x2x1
jax: 0.10.0
libtpu: 0.0.40
codegen_flags: <defaults>
</compile_context>

<pallas_src>
import functools

import jax
import jax.numpy as jnp
from jax import lax
from jax.experimental import pallas as pl
from jax.experimental.pallas import tpu as pltpu

_LANES = 128
_SUBLANES = 8


def _round_up(a, b):
    return ((a + b - 1) // b) * b


# ----------------------------------------------------------------------------
# Batch-tiled path: whole rows fit in a block -> per-row sums in one step.
# ----------------------------------------------------------------------------
def _dice_batch_kernel(x_ref, t_ref, inter_ref, denom_ref, *, rows_per_slab):
    # x_ref, t_ref: (TB, R, 128) block of TB full rows.
    # inter_ref, denom_ref: (TB, 1, 128) per-row partial sums (lane-broadcast).
    tb = x_ref.shape[0]
    num_full = tb // rows_per_slab
    rem = tb - num_full * rows_per_slab

    def rowsum(a):  # (rows, R, 128) -> (rows, 1, 1): VPU adds, one lane reduce
        return jnp.sum(jnp.sum(a, axis=1, keepdims=True), axis=2, keepdims=True)

    def do_slab(start, rows):
        x = x_ref[pl.ds(start, rows)].astype(jnp.float32)
        t = t_ref[pl.ds(start, rows)].astype(jnp.float32)
        inter = rowsum(x * t)
        denom = rowsum(x + t)                      # fused denominator
        inter_ref[pl.ds(start, rows)] = jnp.broadcast_to(inter, (rows, 1, _LANES))
        denom_ref[pl.ds(start, rows)] = jnp.broadcast_to(denom, (rows, 1, _LANES))

    if num_full > 0:
        def body(s, carry):
            do_slab(s * rows_per_slab, rows_per_slab)
            return carry
        lax.fori_loop(0, num_full, body, 0,
                      unroll=num_full if num_full <= 8 else 8)
    if rem > 0:
        do_slab(num_full * rows_per_slab, rem)


# ----------------------------------------------------------------------------
# Chunked path: grid = (virtual rows, feature chunks), per-lane accumulators.
# ----------------------------------------------------------------------------
def _dice_chunk_kernel(x_ref, t_ref, inter_ref, denom_ref, inter_acc, denom_acc,
                       *, valid_rows, tm, sub, ragged_last):
    # x_ref, t_ref  : (1, tm, 128) tile of one (virtual) batch row
    # inter_ref/...: (1, 1, 128) per-row partial sums (written on last chunk)
    # *_acc         : (1, 128) f32 per-lane accumulators (live across chunks)
    j = pl.program_id(1)

    @pl.when(j == 0)
    def _init():
        inter_acc[...] = jnp.zeros_like(inter_acc)
        denom_acc[...] = jnp.zeros_like(denom_acc)

    num_full = tm // sub
    rem = tm - num_full * sub

    def partial_sums(masked):
        def slab(start, row0, nrows):
            x = x_ref[0, pl.ds(start, nrows), :].astype(jnp.float32)
            t = t_ref[0, pl.ds(start, nrows), :].astype(jnp.float32)
            if masked:  # only instantiated for the last (ragged) chunk
                row = lax.broadcasted_iota(jnp.int32, (nrows, _LANES), 0) + row0
                keep = row < valid_rows
                x = jnp.where(keep, x, 0.0)
                t = jnp.where(keep, t, 0.0)
            return (jnp.sum(x * t, axis=0, keepdims=True),
                    jnp.sum(x + t, axis=0, keepdims=True))     # fused denom

        zero = jnp.zeros((1, _LANES), jnp.float32)
        ip, dp = zero, zero
        if num_full > 0:
            def body(s, carry):
                ci, cd = carry
                start = pl.multiple_of(s * sub, sub)
                di, dd = slab(start, j * tm + s * sub, sub)
                return ci + di, cd + dd
            ip, dp = lax.fori_loop(0, num_full, body, (ip, dp),
                                   unroll=num_full if num_full <= 8 else 8)
        if rem > 0:
            di, dd = slab(num_full * sub, j * tm + num_full * sub, rem)
            ip, dp = ip + di, dp + dd
        return ip, dp

    if ragged_last:
        last = pl.num_programs(1) - 1

        @pl.when(j != last)
        def _unmasked():
            ip, dp = partial_sums(False)
            inter_acc[...] += ip
            denom_acc[...] += dp

        @pl.when(j == last)
        def _masked():
            ip, dp = partial_sums(True)
            inter_acc[...] += ip
            denom_acc[...] += dp
    else:
        ip, dp = partial_sums(False)
        inter_acc[...] += ip
        denom_acc[...] += dp

    @pl.when(j == pl.num_programs(1) - 1)
    def _finalize():
        inter_ref[...] = jnp.broadcast_to(jnp.sum(inter_acc[...]),
                                          inter_ref.shape).astype(jnp.float32)
        denom_ref[...] = jnp.broadcast_to(jnp.sum(denom_acc[...]),
                                          denom_ref.shape).astype(jnp.float32)


# ----------------------------------------------------------------------------
# Wrapper
# ----------------------------------------------------------------------------
def dice_loss(inputs, target, *,
              chunk_tile_bytes=4 * 1024 * 1024,
              batch_tile_bytes=2 * 1024 * 1024,
              sub_rows=512):
    """Dice loss over N,... tensors, computed with a Pallas TPU kernel.

    chunk_tile_bytes: per-input tile bytes (native dtype) on the chunked path.
    batch_tile_bytes: per-input tile bytes on the batch-tiled path; the batch
        path is taken when at least 4 rows fit in one tile.
    sub_rows: in-kernel streaming slab (rows of 128 lanes) on the chunked path.
    """
    assert inputs.shape == target.shape
    n = inputs.shape[0]
    x = inputs.reshape(n, -1)      # same as torch .view(N, -1); metadata only
    t = target.reshape(n, -1)
    d = x.shape[1]
    itemsize = max(jnp.dtype(x.dtype).itemsize, jnp.dtype(t.dtype).itemsize)

    # Lane-align the feature dim. For typical segmentation shapes C*H*W is a
    # multiple of 128, so this branch (and its HBM copy) never fires.
    d_pad = _round_up(d, _LANES)
    if d_pad != d:
        pad = ((0, 0), (0, d_pad - d))   # zero-pad does not change any sum
        x = jnp.pad(x, pad)
        t = jnp.pad(t, pad)
    r = d_pad // _LANES
    x = x.reshape(n, r, _LANES)
    t = t.reshape(n, r, _LANES)

    row_bytes = r * _LANES * itemsize
    total_elems = n * r * _LANES
    cost = pl.CostEstimate(
        flops=3 * total_elems,
        transcendentals=0,
        bytes_accessed=2 * total_elems * itemsize + n * 2 * _LANES * 4)
    vmem_limit = 32 * 1024 * 1024   # safe on v5e/v6e/v7x, allows 4 MiB tiles

    if 4 * row_bytes <= batch_tile_bytes:
        # ---- Batch-tiled path (small D, any N): many rows per block. ----
        tb = max(1, min(n, batch_tile_bytes // max(row_bytes, 1)))
        num_blocks = pl.cdiv(n, tb)
        rows_per_slab = max(1, 256 // max(r, 1))   # ~128 KiB f32 per slab
        kernel = functools.partial(_dice_batch_kernel,
                                   rows_per_slab=rows_per_slab)
        inter_out, denom_out = pl.pallas_call(
            kernel,
            out_shape=(jax.ShapeDtypeStruct((n, 1, _LANES), jnp.float32),
                       jax.ShapeDtypeStruct((n, 1, _LANES), jnp.float32)),
            grid_spec=pltpu.PrefetchScalarGridSpec(
                num_scalar_prefetch=0,
                grid=(num_blocks,),
                in_specs=[pl.BlockSpec((tb, r, _LANES), lambda i: (i, 0, 0)),
                          pl.BlockSpec((tb, r, _LANES), lambda i: (i, 0, 0))],
                out_specs=[pl.BlockSpec((tb, 1, _LANES), lambda i: (i, 0, 0)),
                           pl.BlockSpec((tb, 1, _LANES), lambda i: (i, 0, 0))],
            ),
            compiler_params=pltpu.CompilerParams(
                dimension_semantics=("parallel",),
                vmem_limit_bytes=vmem_limit),
            cost_estimate=cost,
        )(x, t)
        inter = inter_out[:, 0, 0]
        denom = denom_out[:, 0, 0]
        split = 1
    else:
        # ---- Chunked path (large D): per-row reduction over feature chunks. -
        sub = max(_SUBLANES, (sub_rows // _SUBLANES) * _SUBLANES)
        # N == 1: split the row into 2 virtual rows (metadata reshape) so the
        # "parallel" batch axis can use both TensorCores on v7x megacore.
        split = 2 if (n == 1 and r % 2 == 0 and (r // 2) >= sub) else 1
        ns = n * split
        r_v = r // split
        xv = x.reshape(ns, r_v, _LANES)
        tv = t.reshape(ns, r_v, _LANES)

        tm_cap = max(sub, (chunk_tile_bytes // (_LANES * itemsize) // sub) * sub)
        tm_eff = r_v if r_v <= tm_cap else tm_cap
        num_chunks = pl.cdiv(r_v, tm_eff)
        ragged_last = (r_v % tm_eff) != 0

        kernel = functools.partial(_dice_chunk_kernel, valid_rows=r_v,
                                   tm=tm_eff, sub=sub, ragged_last=ragged_last)
        inter_out, denom_out = pl.pallas_call(
            kernel,
            out_shape=(jax.ShapeDtypeStruct((ns, 1, _LANES), jnp.float32),
                       jax.ShapeDtypeStruct((ns, 1, _LANES), jnp.float32)),
            grid_spec=pltpu.PrefetchScalarGridSpec(
                num_scalar_prefetch=0,
                grid=(ns, num_chunks),
                in_specs=[pl.BlockSpec((1, tm_eff, _LANES), lambda b, j: (b, j, 0)),
                          pl.BlockSpec((1, tm_eff, _LANES), lambda b, j: (b, j, 0))],
                out_specs=[pl.BlockSpec((1, 1, _LANES), lambda b, j: (b, 0, 0)),
                           pl.BlockSpec((1, 1, _LANES), lambda b, j: (b, 0, 0))],
                scratch_shapes=[pltpu.VMEM((1, _LANES), jnp.float32),
                                pltpu.VMEM((1, _LANES), jnp.float32)],
            ),
            compiler_params=pltpu.CompilerParams(
                dimension_semantics=("parallel", "arbitrary"),
                vmem_limit_bytes=vmem_limit),
            cost_estimate=cost,
        )(xv, tv)
        inter = inter_out[:, 0, 0]
        denom = denom_out[:, 0, 0]

    if split > 1:
        inter = inter.reshape(n, split).sum(axis=1)
        denom = denom.reshape(n, split).sum(axis=1)

    smooth = jnp.float32(1.0)
    dice = 2.0 * (inter + smooth) / (denom + smooth)   # exact divide (wrapper)
    return 1.0 - jnp.sum(dice) / jnp.float32(n)


def dice_loss_ref(inputs, target):
    """Pure-JAX reference identical to the PyTorch forward."""
    n = target.shape[0]
    smooth = 1.0
    x = inputs.reshape(n, -1)
    t = target.reshape(n, -1)
    inter = jnp.sum(x * t, axis=1)
    loss = 2.0 * (inter + smooth) / (jnp.sum(x, axis=1) + jnp.sum(t, axis=1) + smooth)
    return 1.0 - jnp.sum(loss) / n


if __name__ == "__main__":
    key = jax.random.PRNGKey(0)
    ks = jax.random.split(key, 8)

    # 1) Primary NCHW demo: batch=2, channels=4, spatial 16x16 (D=1024) -> batch path.
    x1 = jax.nn.sigmoid(jax.random.normal(ks[0], (2, 4, 16, 16), dtype=jnp.float32))
    y1 = (jax.random.uniform(ks[1], (2, 4, 16, 16)) > 0.5).astype(jnp.float32)
    out1 = jax.block_until_ready(dice_loss(x1, y1))
    ref1 = jax.block_until_ready(dice_loss_ref(x1, y1))
    assert jnp.allclose(out1, ref1, rtol=1e-5, atol=1e-5), (out1, ref1)

    # 2) Chunked path with a ragged, masked last chunk (D=1152 -> R=9, tm=8).
    x2 = jax.nn.sigmoid(jax.random.normal(ks[2], (2, 4, 16, 18), dtype=jnp.float32))
    y2 = (jax.random.uniform(ks[3], (2, 4, 16, 18)) > 0.5).astype(jnp.float32)
    ref2 = jax.block_until_ready(dice_loss_ref(x2, y2))
    out2 = jax.block_until_ready(
        dice_loss(x2, y2, batch_tile_bytes=0, chunk_tile_bytes=1, sub_rows=8))
    assert jnp.allclose(out2, ref2, rtol=1e-5, atol=1e-5), (out2, ref2)

    # 3) Chunked path, single chunk with a ragged sub-slice tail (rem > 0).
    out3 = jax.block_until_ready(dice_loss(x2, y2, batch_tile_bytes=0, sub_rows=8))
    assert jnp.allclose(out3, ref2, rtol=1e-5, atol=1e-5), (out3, ref2)

    # 4) Non-128-aligned feature dim fallback (D=300 -> padded to 384).
    x4 = jax.nn.sigmoid(jax.random.normal(ks[4], (2, 3, 10, 10), dtype=jnp.float32))
    y4 = (jax.random.uniform(ks[5], (2, 3, 10, 10)) > 0.5).astype(jnp.float32)
    out4 = jax.block_until_ready(dice_loss(x4, y4))
    ref4 = jax.block_until_ready(dice_loss_ref(x4, y4))
    assert jnp.allclose(out4, ref4, rtol=1e-5, atol=1e-5), (out4, ref4)

    # 5) N == 1: row split into 2 virtual rows (v7x megacore) and merged outside.
    x5 = jax.nn.sigmoid(jax.random.normal(ks[6], (1, 4, 64, 64), dtype=jnp.float32))
    y5 = (jax.random.uniform(ks[7], (1, 4, 64, 64)) > 0.5).astype(jnp.float32)
    out5 = jax.block_until_ready(dice_loss(x5, y5, batch_tile_bytes=0, sub_rows=8))
    ref5 = jax.block_until_ready(dice_loss_ref(x5, y5))
    assert jnp.allclose(out5, ref5, rtol=1e-5, atol=1e-5), (out5, ref5)

    print("KERNEL_OK")
</pallas_src>

<mosaic_0001>
module attributes {stable_mosaic.version = 11 : i64} {
  func.func @_dice_batch_kernel(%arg0: i32, %arg1: memref<2x8x128xf32, #tpu.memory_space<vmem>>, %arg2: memref<2x8x128xf32, #tpu.memory_space<vmem>>, %arg3: memref<2x1x128xf32, #tpu.memory_space<vmem>>, %arg4: memref<2x1x128xf32, #tpu.memory_space<vmem>>) attributes {dimension_semantics = [#tpu.dimension_semantics<parallel>], iteration_bounds = array<i64: 1>, scalar_prefetch = 0 : i64, scratch_operands = 0 : i64, tpu.core_type = #tpu.core_type<tc>, window_params = [{transform_indices = @transform_0, window_bounds = array<i64: 2, 8, 128>}, {transform_indices = @transform_1, window_bounds = array<i64: 2, 8, 128>}, {transform_indices = @transform_2, window_bounds = array<i64: 2, 1, 128>}, {transform_indices = @transform_3, window_bounds = array<i64: 2, 1, 128>}]} {
    %c0 = arith.constant 0 : index
    %c0_0 = arith.constant 0 : index
    %c0_1 = arith.constant 0 : index
    %0 = vector.load %arg1[%c0, %c0_0, %c0_1] : memref<2x8x128xf32, #tpu.memory_space<vmem>>, vector<2x8x128xf32>
    %c0_2 = arith.constant 0 : index
    %c0_3 = arith.constant 0 : index
    %c0_4 = arith.constant 0 : index
    %1 = vector.load %arg2[%c0_2, %c0_3, %c0_4] : memref<2x8x128xf32, #tpu.memory_space<vmem>>, vector<2x8x128xf32>
    %2 = arith.mulf %0, %1 : vector<2x8x128xf32>
    %cst = arith.constant dense<0.000000e+00> : vector<2x128xf32>
    %3 = vector.multi_reduction <add>, %2, %cst [1] : vector<2x8x128xf32> to vector<2x128xf32>
    %4 = vector.shape_cast %3 : vector<2x128xf32> to vector<2x1x128xf32>
    %cst_5 = arith.constant dense<0.000000e+00> : vector<2x1xf32>
    %5 = vector.multi_reduction <add>, %4, %cst_5 [2] : vector<2x1x128xf32> to vector<2x1xf32>
    %6 = vector.shape_cast %5 : vector<2x1xf32> to vector<2x1x1xf32>
    %7 = arith.addf %0, %1 : vector<2x8x128xf32>
    %cst_6 = arith.constant dense<0.000000e+00> : vector<2x128xf32>
    %8 = vector.multi_reduction <add>, %7, %cst_6 [1] : vector<2x8x128xf32> to vector<2x128xf32>
    %9 = vector.shape_cast %8 : vector<2x128xf32> to vector<2x1x128xf32>
    %cst_7 = arith.constant dense<0.000000e+00> : vector<2x1xf32>
    %10 = vector.multi_reduction <add>, %9, %cst_7 [2] : vector<2x1x128xf32> to vector<2x1xf32>
    %11 = vector.shape_cast %10 : vector<2x1xf32> to vector<2x1x1xf32>
    %12 = vector.shape_cast %6 : vector<2x1x1xf32> to vector<2x1x1xf32>
    %13 = vector.broadcast %12 : vector<2x1x1xf32> to vector<2x1x128xf32>
    %c0_8 = arith.constant 0 : index
    %c0_9 = arith.constant 0 : index
    %c0_10 = arith.constant 0 : index
    %14 = vector.load %arg3[%c0_8, %c0_9, %c0_10] : memref<2x1x128xf32, #tpu.memory_space<vmem>>, vector<2x1x128xf32>
    tpu.vector_store %arg3[%c0_8, %c0_9, %c0_10], %13 {strides = array<i32>} : memref<2x1x128xf32, #tpu.memory_space<vmem>>, vector<2x1x128xf32>,
    %15 = vector.shape_cast %11 : vector<2x1x1xf32> to vector<2x1x1xf32>
    %16 = vector.broadcast %15 : vector<2x1x1xf32> to vector<2x1x128xf32>
    %c0_11 = arith.constant 0 : index
    %c0_12 = arith.constant 0 : index
    %c0_13 = arith.constant 0 : index
    %17 = vector.load %arg4[%c0_11, %c0_12, %c0_13] : memref<2x1x128xf32, #tpu.memory_space<vmem>>, vector<2x1x128xf32>
    tpu.vector_store %arg4[%c0_11, %c0_12, %c0_13], %16 {strides = array<i32>} : memref<2x1x128xf32, #tpu.memory_space<vmem>>, vector<2x1x128xf32>,
    return
  }
  func.func @transform_0(%arg0: i32) -> (i32, i32, i32) {
    %c0_i32 = arith.constant 0 : i32
    %c0_i32_0 = arith.constant 0 : i32
    %c0_i32_1 = arith.constant 0 : i32
    return %arg0, %c0_i32, %c0_i32_0 : i32, i32, i32
  }
  func.func @transform_1(%arg0: i32) -> (i32, i32, i32) {
    %c0_i32 = arith.constant 0 : i32
    %c0_i32_0 = arith.constant 0 : i32
    %c0_i32_1 = arith.constant 0 : i32
    return %arg0, %c0_i32, %c0_i32_0 : i32, i32, i32
  }
  func.func @transform_2(%arg0: i32) -> (i32, i32, i32) {
    %c0_i32 = arith.constant 0 : i32
    %c0_i32_0 = arith.constant 0 : i32
    %c0_i32_1 = arith.constant 0 : i32
    return %arg0, %c0_i32, %c0_i32_0 : i32, i32, i32
  }
  func.func @transform_3(%arg0: i32) -> (i32, i32, i32) {
    %c0_i32 = arith.constant 0 : i32
    %c0_i32_0 = arith.constant 0 : i32
    %c0_i32_1 = arith.constant 0 : i32
    return %arg0, %c0_i32, %c0_i32_0 : i32, i32, i32
  }
}

</mosaic_0001>

<bundles_post_ra>
// kernel: tpu_custom_call.1
= control target key start
LH: loop header
LB: loop body
LE: loop exit
PB: predicated region body
PF: predicated region fallthrough
CT: control target
= control target key end

     0   :  { %9 = vsyncpa [#allocation3], 0  ;;  %s257_s0 = inlined_call_operand.hbm [shape: f32[2,8,128], index: 0, kind: input, shape index: {}]   ;;  %s258_s1 = inlined_call_operand.hbm [shape: f32[2,8,128], index: 1, kind: input, shape index: {}]   ;;  %s259_s2 = inlined_call_operand.hbm [shape: f32[2,1,128], index: 2, kind: output, shape index: {0}]   ;;  %s260_s3 = inlined_call_operand.hbm [shape: f32[2,1,128], index: 3, kind: output, shape index: {1}]  }
   0x1   :  { %10 = vsyncpa [#allocation6], 0 }
   0x2   :  { %11 = vsyncpa [#allocation4], 0 }
   0x3   :  { %12 = vsyncpa [#allocation9], 0  ;;  %s217_s12 = smov [#allocation2]  }
   0x4   :  { %s18_s13 = sshll.u32 %s217_s12, 4  ;;  %s19_s13 = int_to_ptr.vmem [resolvable:$true] %s18_s13 }
   0x5   :  { %s137_s14 = scalar_lea.vmem %s19_s13, 256  ;;  %p142_p1 = scmp.lt.s32.totalorder %s19_s13, %s19_s13 }
   0x6   :  { %p138_p0 = scmp.ne.s32.totalorder %s19_s13, %s137_s14  ;;  %p143_p2 = scmp.lt.s32.totalorder %s137_s14, %s137_s14 }
   0x8   :  { %p144_p3 = por %p143_p2, %p142_p1 }
   0xa   :  { %p145_p4 = pnand %p144_p3, %p138_p0 }
   0xc   :  { %148 = shalt.err (!%p145_p4)
}
   0xd   :  { %s218_s15 = smov 128   ;;  %s219_s16 = smov 8  }
   0xe   :  { %24 = dma.hbm_to_vmem [thread:$0]  %s257_s0, 256, %s19_s13, [#allocation3], %s218_s15, %s218_s15, %s219_s16  }
   0xf   :  { %s220_s19 = smov [#allocation5]  }
  0x10   :  { %s30_s20 = sshll.u32 %s220_s19, 4  ;;  %s31_s20 = int_to_ptr.vmem [resolvable:$true] %s30_s20 }
  0x11   :  { %s157_s21 = scalar_lea.vmem %s31_s20, 256  ;;  %p162_p6 = scmp.lt.s32.totalorder %s31_s20, %s31_s20 }
  0x12   :  { %p158_p5 = scmp.ne.s32.totalorder %s31_s20, %s157_s21  ;;  %p163_p7 = scmp.lt.s32.totalorder %s157_s21, %s157_s21 }
  0x14   :  { %p164_p8 = por %p163_p7, %p162_p6 }
  0x16   :  { %p165_p9 = pnand %p164_p8, %p158_p5 }
  0x18   :  { %168 = shalt.err (!%p165_p9)
}
  0x19   :  { %36 = dma.hbm_to_vmem [thread:$0]  %s258_s1, 256, %s31_s20, [#allocation6], %s218_s15, %s218_s15, %s219_s16  }
  0x1a   :  { %209 = dma.done.wait [#allocation3], 256  }
  0x1b   :  { %210 = vsyncadd [#allocation3], 4294967040 }
  0x1c   :  { %211 = dma.done.wait [#allocation6], 256  }
  0x1d   :  { %212 = vsyncadd [#allocation6], 4294967040  ;;  %v43_v0 = vld [vmem:[#allocation2] sm:$0xff]  ;;  %v45_v1 = vld [vmem:[#allocation5] sm:$0xff]  ;;  %s221_s0 = smov [#allocation7]   ;;  %s222_s24 = smov [#allocation8]  }
  0x1e   :  { %v44_v2 = vld [vmem:[#allocation2 + $0x8] sm:$0xff]  ;;  %v65_v3 = vadd.f32 %v45_v1, %v43_v0  ;;  %v47_v4 = vmul.f32 %v45_v1, %v43_v0  ;;  %v46_v5 = vld [vmem:[#allocation5 + $0x8] sm:$0xff]  ;;  %s92_s1 = sshll.u32 %s221_s0, 4  ;;  %s104_s25 = sshll.u32 %s222_s24, 4  ;;  %s93_s1 = int_to_ptr.vmem [resolvable:$true] %s92_s1  ;;  %s105_s25 = int_to_ptr.vmem [resolvable:$true] %s104_s25 }
  0x1f   :  { %v66_v6 = vadd.f32 %v46_v5, %v44_v2  ;;  %v48_v7 = vmul.f32 %v46_v5, %v44_v2  ;;  %s169_s26 = scalar_lea.vmem %s93_s1, 32  ;;  %p174_p11 = scmp.lt.s32.totalorder %s93_s1, %s93_s1 }
  0x20   :  { %v67_v8 = vrot.slane %v65_v3, 4  ;;  %v49_v9 = vrot.slane %v47_v4, 4  ;;  %p170_p10 = scmp.ne.s32.totalorder %s93_s1, %s169_s26  ;;  %p175_p12 = scmp.lt.s32.totalorder %s169_s26, %s169_s26 }
  0x21   :  { %v73_v10 = vrot.slane %v66_v6, 4  ;;  %v55_v11 = vrot.slane %v48_v7, 4 }
  0x22   :  { %v68_v12 = vadd.f32 %v67_v8, %v65_v3  ;;  %v50_v13 = vadd.f32 %v49_v9, %v47_v4  ;;  %p176_p13 = por %p175_p12, %p174_p11 }
  0x23   :  { %v74_v14 = vadd.f32 %v73_v10, %v66_v6  ;;  %v56_v15 = vadd.f32 %v55_v11, %v48_v7 }
  0x24   :  { %v69_v16 = vrot.slane %v68_v12, 2  ;;  %v51_v17 = vrot.slane %v50_v13, 2  ;;  %p177_p0 = pnand %p176_p13, %p170_p10 }
  0x25   :  { %v75_v18 = vrot.slane %v74_v14, 2  ;;  %v57_v19 = vrot.slane %v56_v15, 2 }
  0x26   :  { %v70_v20 = vadd.f32 %v69_v16, %v68_v12  ;;  %v52_v21 = vadd.f32 %v51_v17, %v50_v13 }
  0x27   :  { %v76_v22 = vadd.f32 %v75_v18, %v74_v14  ;;  %v58_v23 = vadd.f32 %v57_v19, %v56_v15 }
  0x28   :  { %v71_v24 = vrot.slane %v70_v20, 1  ;;  %v53_v25 = vrot.slane %v52_v21, 1 }
  0x29   :  { %v77_v26 = vrot.slane %v76_v22, 1  ;;  %v59_v27 = vrot.slane %v58_v23, 1 }
  0x2a   :  { %v72_v28 = vadd.f32 %v71_v24, %v70_v20  ;;  %v54_v29 = vadd.f32 %v53_v25, %v52_v21 }
  0x2b   :  { %v78_v30 = vadd.f32 %v77_v26, %v76_v22  ;;  %v60_v31 = vadd.f32 %v59_v27, %v58_v23 }
  0x2c   :  { %79 = vadd.xlane.f32.xlu1 %v72_v28  ;;  %61 = vadd.xlane.f32.xlu0 %v54_v29 }
  0x30   :  { %81 = vadd.xlane.f32.xlu1 %v78_v30  ;;  %63 = vadd.xlane.f32.xlu0 %v60_v31 }
  0xb5   :  { %v80_v32 = vpop.xlane.xlu1 %79  ;;  %v62_v33 = vpop.xlane.xlu0 %61 }
  0xb6   :  { %85 = vst [vmem:[#allocation8] sm:$0x1] %v80_v32  ;;  %83 = vst [vmem:[#allocation7] sm:$0x1] %v62_v33 }
  0xb9   :  { %v82_v34 = vpop.xlane.xlu1 %81  ;;  %v64_v35 = vpop.xlane.xlu0 %63 }
  0xba   :  { %86 = vst [vmem:[#allocation8 + $0x1] sm:$0x1] %v82_v34  ;;  %84 = vst [vmem:[#allocation7 + $0x1] sm:$0x1] %v64_v35 }
  0xbb   :  { %180 = shalt.err (!%p177_p0)
}
  0xbc   :  { %s223_s27 = smov 16   ;;  %s224_s28 = smov 1  }
  0xbd   :  { %98 = dma.vmem_to_hbm [thread:$0]  %s93_s1, 32, %s259_s2, [#allocation4], %s223_s27, %s223_s27, %s224_s28  }
  0xbe   :  { %s189_s4 = scalar_lea.vmem %s105_s25, 32  ;;  %p194_p2 = scmp.lt.s32.totalorder %s105_s25, %s105_s25 }
  0xbf   :  { %p190_p1 = scmp.ne.s32.totalorder %s105_s25, %s189_s4  ;;  %p195_p3 = scmp.lt.s32.totalorder %s189_s4, %s189_s4 }
  0xc1   :  { %p196_p4 = por %p195_p3, %p194_p2 }
  0xc3   :  { %p197_p5 = pnand %p196_p4, %p190_p1 }
  0xc5   :  { %200 = shalt.err (!%p197_p5)
}
  0xc6   :  { %110 = dma.vmem_to_hbm [thread:$0]  %s105_s25, 32, %s260_s3, [#allocation9], %s223_s27, %s223_s27, %s224_s28  }
  0xc7   :  { %213 = dma.done.wait [#allocation4], 32  }
  0xc8   :  { %214 = vsyncadd [#allocation4], 4294967264 }
  0xc9   :  { %215 = dma.done.wait [#allocation9], 32  }
  0xca   :  { %216 = vsyncadd [#allocation9], 4294967264 }
  0xcb   :  { %117 = vsyncpa [#allocation3], 1 }
  0xcc   :  { %118 = vsyncpa [#allocation6], 1 }
  0xcd   :  { %119 = vsyncpa [#allocation4], 1 }
  0xce   :  { %120 = vsyncpa [#allocation9], 1 }

</bundles_post_ra>
